<compile_context>
chip_gen: v7x
topology: tpu7x:2x2x1
jax: 0.10.0
libtpu: 0.0.40
codegen_flags: <defaults>
</compile_context>

<pallas_src>
import math
import jax
import jax.numpy as jnp
from jax.experimental import pallas as pl
from jax.experimental.pallas import tpu as pltpu


def encoder_layer_kernel(
    x_q_ref, x_kv_ref, mask_ref,
    wq_ref, bq_ref, wk_ref, bk_ref, wv_ref, bv_ref,
    wo_ref, bo_ref,
    g1_ref, be1_ref,
    w1_ref, bf1_ref, w2_ref, bf2_ref,
    g2_ref, be2_ref,
    out_ref,
):
    f32 = jnp.float32
    bf16 = jnp.bfloat16
    eps = 1e-5

    x_q = x_q_ref[...]        # (TQ, D) f32 -- query tile / residual path
    x_kv = x_kv_ref[...]      # (L,  D) f32 -- full sequence for K/V
    # Hoisted out of the head loop: one compare per tile, reused by every head.
    neg_mask = mask_ref[...] == 0.0   # (1, L) bool, broadcast over query rows

    TQ, D = x_q.shape
    H = wq_ref.shape[1] // D
    scale = 1.0 / math.sqrt(D)  # d_tensor == d_model per head in this module

    xq_b = x_q.astype(bf16)
    xkv_b = x_kv.astype(bf16)

    # --- QKV projections: bf16 MXU operands, f32 accumulation ---
    q = jnp.dot(xq_b, wq_ref[...].astype(bf16), preferred_element_type=f32) + bq_ref[...]
    k = jnp.dot(xkv_b, wk_ref[...].astype(bf16), preferred_element_type=f32) + bk_ref[...]
    v = jnp.dot(xkv_b, wv_ref[...].astype(bf16), preferred_element_type=f32) + bv_ref[...]

    # --- per-head attention, accumulating straight into the output projection ---
    wo = wo_ref[...]
    attn = jnp.zeros((TQ, D), f32)
    for h in range(H):  # static small loop over heads
        lo, hi = h * D, (h + 1) * D
        qh = q[:, lo:hi].astype(bf16)
        kh = k[:, lo:hi].astype(bf16)
        vh = v[:, lo:hi].astype(bf16)
        score = jnp.dot(qh, kh.T, preferred_element_type=f32) * scale   # (TQ, L) f32
        score = jnp.where(neg_mask, -10000.0, score)                    # masked_fill(mask==0, -1e4)
        score = score - jnp.max(score, axis=-1, keepdims=True)          # stable softmax (f32)
        p = jnp.exp(score)
        p = p * pl.reciprocal(jnp.sum(p, axis=-1, keepdims=True), approx=True)
        ctx_h = jnp.dot(p.astype(bf16), vh, preferred_element_type=f32)  # (TQ, D)
        attn = attn + jnp.dot(ctx_h.astype(bf16), wo[lo:hi, :].astype(bf16),
                              preferred_element_type=f32)
    attn = attn + bo_ref[...]

    # dropout1: identity (eval mode)
    y = attn + x_q
    mu = jnp.mean(y, axis=-1, keepdims=True)
    var = jnp.mean((y - mu) ** 2, axis=-1, keepdims=True)
    y = (y - mu) * jax.lax.rsqrt(var + eps) * g1_ref[...] + be1_ref[...]

    # --- position-wise FFN, chunked over the hidden dim ---
    F = w1_ref.shape[1]
    FC = 512 if (F % 512 == 0) else F          # chunk size over d_ff
    w1 = w1_ref[...]
    w2 = w2_ref[...]
    bf1 = bf1_ref[...]
    y_b = y.astype(bf16)
    ff = jnp.zeros((TQ, D), f32)
    for c0 in range(0, F, FC):                  # static loop, bounds live (TQ, FC)
        h1 = jnp.dot(y_b, w1[:, c0:c0 + FC].astype(bf16),
                     preferred_element_type=f32) + bf1[:, c0:c0 + FC]
        h1 = jnp.maximum(h1, 0.0)               # ReLU; FFN dropout is identity
        ff = ff + jnp.dot(h1.astype(bf16), w2[c0:c0 + FC, :].astype(bf16),
                          preferred_element_type=f32)
    ff = ff + bf2_ref[...]

    # dropout2: identity (eval mode)
    z = ff + y
    mu2 = jnp.mean(z, axis=-1, keepdims=True)
    var2 = jnp.mean((z - mu2) ** 2, axis=-1, keepdims=True)
    z = (z - mu2) * jax.lax.rsqrt(var2 + eps) * g2_ref[...] + be2_ref[...]

    out_ref[...] = z.astype(out_ref.dtype)


def encoder_layer(x, s_mask, params, *, q_tile=128):
    """x: (B, L, D) float32; s_mask: (B, L) {0,1}."""
    B, L, D = x.shape
    H = params["wq"].shape[1] // D
    F = params["w1"].shape[1]

    TQ = min(L, q_tile)
    assert L % TQ == 0, "sequence length must be divisible by the query tile"
    NQ = L // TQ

    mask = s_mask.astype(jnp.float32).reshape(B, 1, L)

    def const2d(shape):
        # Constant blocks (weights / biases): same block every grid step -> fetched once.
        return pl.BlockSpec(shape, lambda b, qi: (0, 0))

    in_specs = [
        pl.BlockSpec((None, TQ, D), lambda b, qi: (b, qi, 0)),  # x (query tile)
        pl.BlockSpec((None, L, D),  lambda b, qi: (b, 0, 0)),   # x (full seq, for K/V)
        pl.BlockSpec((None, 1, L),  lambda b, qi: (b, 0, 0)),   # key mask
        const2d((D, H * D)), const2d((1, H * D)),               # W_Q, b_Q
        const2d((D, H * D)), const2d((1, H * D)),               # W_K, b_K
        const2d((D, H * D)), const2d((1, H * D)),               # W_V, b_V
        const2d((H * D, D)), const2d((1, D)),                   # attn output proj
        const2d((1, D)), const2d((1, D)),                       # norm1 gamma, beta
        const2d((D, F)), const2d((1, F)),                       # ffn linear1
        const2d((F, D)), const2d((1, D)),                       # ffn linear2
        const2d((1, D)), const2d((1, D)),                       # norm2 gamma, beta
    ]

    return pl.pallas_call(
        encoder_layer_kernel,
        out_shape=jax.ShapeDtypeStruct((B, L, D), x.dtype),
        grid=(B, NQ),
        in_specs=in_specs,
        out_specs=pl.BlockSpec((None, TQ, D), lambda b, qi: (b, qi, 0)),
        compiler_params=pltpu.CompilerParams(
            dimension_semantics=("parallel", "parallel"),
            vmem_limit_bytes=48 * 1024 * 1024,
        ),
    )(
        x, x, mask,
        params["wq"], params["bq"], params["wk"], params["bk"],
        params["wv"], params["bv"], params["wo"], params["bo"],
        params["g1"], params["be1"],
        params["w1"], params["bf1"], params["w2"], params["bf2"],
        params["g2"], params["be2"],
    )


def reference_encoder_layer(x, s_mask, params):
    """Pure-JAX f32 reference mirroring the PyTorch forward (eval mode)."""
    B, L, D = x.shape
    H = params["wq"].shape[1] // D
    q = x @ params["wq"] + params["bq"]
    k = x @ params["wk"] + params["bk"]
    v = x @ params["wv"] + params["bv"]
    q = q.reshape(B, L, H, D).transpose(0, 2, 1, 3)
    k = k.reshape(B, L, H, D).transpose(0, 2, 1, 3)
    v = v.reshape(B, L, H, D).transpose(0, 2, 1, 3)
    score = jnp.einsum("bhqd,bhkd->bhqk", q, k) / math.sqrt(D)
    mask = s_mask[:, None, None, :].astype(jnp.float32)  # broadcast to (B,H,L,L)
    score = jnp.where(mask == 0.0, -10000.0, score)
    p = jax.nn.softmax(score, axis=-1)
    ctx = jnp.einsum("bhqk,bhkd->bhqd", p, v)
    ctx = ctx.transpose(0, 2, 1, 3).reshape(B, L, H * D)
    attn = ctx @ params["wo"] + params["bo"]

    def ln(t, g, b):
        mu = t.mean(-1, keepdims=True)
        var = ((t - mu) ** 2).mean(-1, keepdims=True)
        return (t - mu) / jnp.sqrt(var + 1e-5) * g + b

    y = ln(attn + x, params["g1"], params["be1"])
    h1 = jnp.maximum(y @ params["w1"] + params["bf1"], 0.0)
    ff = h1 @ params["w2"] + params["bf2"]
    return ln(ff + y, params["g2"], params["be2"])


def init_params(key, d_model, ffn_hidden, n_head):
    D, F, H = d_model, ffn_hidden, n_head
    keys = jax.random.split(key, 12)

    def linear(kk, fan_in, fan_out):
        bound = 1.0 / math.sqrt(fan_in)
        w = jax.random.uniform(kk, (fan_in, fan_out), jnp.float32, -bound, bound)
        b = jax.random.uniform(jax.random.fold_in(kk, 1), (1, fan_out), jnp.float32, -bound, bound)
        return w, b

    wq, bq = linear(keys[0], D, D * H)
    wk, bk = linear(keys[1], D, D * H)
    wv, bv = linear(keys[2], D, D * H)
    wo, bo = linear(keys[3], D * H, D)
    w1, bf1 = linear(keys[4], D, F)
    w2, bf2 = linear(keys[5], F, D)
    return dict(
        wq=wq, bq=bq, wk=wk, bk=bk, wv=wv, bv=bv, wo=wo, bo=bo,
        g1=jnp.ones((1, D), jnp.float32), be1=jnp.zeros((1, D), jnp.float32),
        w1=w1, bf1=bf1, w2=w2, bf2=bf2,
        g2=jnp.ones((1, D), jnp.float32), be2=jnp.zeros((1, D), jnp.float32),
    )


if __name__ == "__main__":
    B, L, D, H, F = 2, 8, 32, 2, 64  # batch, seq, d_model, n_head, ffn_hidden
    key = jax.random.PRNGKey(0)
    kx, kp = jax.random.split(key)

    x = jax.random.normal(kx, (B, L, D), jnp.float32)
    # attention mask over key positions: second example has last 2 tokens padded
    s_mask = jnp.ones((B, L), jnp.int32).at[1, -2:].set(0)
    params = init_params(kp, D, F, H)

    out = encoder_layer(x, s_mask, params)
    out = jax.block_until_ready(out)

    ref = reference_encoder_layer(x, s_mask, params)
    assert out.shape == (B, L, D)
    # Kernel uses bf16 MXU operands + approximate reciprocal; compare against the
    # f32 reference with a bf16-appropriate tolerance.
    assert jnp.allclose(out, ref, atol=5e-2, rtol=5e-2), "mismatch vs JAX reference"
    print("KERNEL_OK")
</pallas_src>

<mosaic_0001>
module attributes {stable_mosaic.version = 11 : i64} {
  func.func @encoder_layer_kernel(%arg0: i32, %arg1: i32, %arg2: memref<1x8x32xf32, #tpu.memory_space<vmem>>, %arg3: memref<1x8x32xf32, #tpu.memory_space<vmem>>, %arg4: memref<1x1x8xf32, #tpu.memory_space<vmem>>, %arg5: memref<32x64xf32, #tpu.memory_space<vmem>>, %arg6: memref<1x64xf32, #tpu.memory_space<vmem>>, %arg7: memref<32x64xf32, #tpu.memory_space<vmem>>, %arg8: memref<1x64xf32, #tpu.memory_space<vmem>>, %arg9: memref<32x64xf32, #tpu.memory_space<vmem>>, %arg10: memref<1x64xf32, #tpu.memory_space<vmem>>, %arg11: memref<64x32xf32, #tpu.memory_space<vmem>>, %arg12: memref<1x32xf32, #tpu.memory_space<vmem>>, %arg13: memref<1x32xf32, #tpu.memory_space<vmem>>, %arg14: memref<1x32xf32, #tpu.memory_space<vmem>>, %arg15: memref<32x64xf32, #tpu.memory_space<vmem>>, %arg16: memref<1x64xf32, #tpu.memory_space<vmem>>, %arg17: memref<64x32xf32, #tpu.memory_space<vmem>>, %arg18: memref<1x32xf32, #tpu.memory_space<vmem>>, %arg19: memref<1x32xf32, #tpu.memory_space<vmem>>, %arg20: memref<1x32xf32, #tpu.memory_space<vmem>>, %arg21: memref<1x8x32xf32, #tpu.memory_space<vmem>>) attributes {dimension_semantics = [#tpu.dimension_semantics<parallel>, #tpu.dimension_semantics<parallel>], iteration_bounds = array<i64: 2, 1>, scalar_prefetch = 0 : i64, scratch_operands = 0 : i64, tpu.core_type = #tpu.core_type<tc>, window_params = [{transform_indices = @transform_0, window_bounds = array<i64: 1, 8, 32>}, {transform_indices = @transform_1, window_bounds = array<i64: 1, 8, 32>}, {transform_indices = @transform_2, window_bounds = array<i64: 1, 1, 8>}, {pipeline_mode = #tpu.pipeline_mode<synchronous>, transform_indices = @transform_3, window_bounds = array<i64: 32, 64>}, {pipeline_mode = #tpu.pipeline_mode<synchronous>, transform_indices = @transform_4, window_bounds = array<i64: 1, 64>}, {pipeline_mode = #tpu.pipeline_mode<synchronous>, transform_indices = @transform_5, window_bounds = array<i64: 32, 64>}, {pipeline_mode = #tpu.pipeline_mode<synchronous>, transform_indices = @transform_6, window_bounds = array<i64: 1, 64>}, {pipeline_mode = #tpu.pipeline_mode<synchronous>, transform_indices = @transform_7, window_bounds = array<i64: 32, 64>}, {pipeline_mode = #tpu.pipeline_mode<synchronous>, transform_indices = @transform_8, window_bounds = array<i64: 1, 64>}, {pipeline_mode = #tpu.pipeline_mode<synchronous>, transform_indices = @transform_9, window_bounds = array<i64: 64, 32>}, {pipeline_mode = #tpu.pipeline_mode<synchronous>, transform_indices = @transform_10, window_bounds = array<i64: 1, 32>}, {pipeline_mode = #tpu.pipeline_mode<synchronous>, transform_indices = @transform_11, window_bounds = array<i64: 1, 32>}, {pipeline_mode = #tpu.pipeline_mode<synchronous>, transform_indices = @transform_12, window_bounds = array<i64: 1, 32>}, {pipeline_mode = #tpu.pipeline_mode<synchronous>, transform_indices = @transform_13, window_bounds = array<i64: 32, 64>}, {pipeline_mode = #tpu.pipeline_mode<synchronous>, transform_indices = @transform_14, window_bounds = array<i64: 1, 64>}, {pipeline_mode = #tpu.pipeline_mode<synchronous>, transform_indices = @transform_15, window_bounds = array<i64: 64, 32>}, {pipeline_mode = #tpu.pipeline_mode<synchronous>, transform_indices = @transform_16, window_bounds = array<i64: 1, 32>}, {pipeline_mode = #tpu.pipeline_mode<synchronous>, transform_indices = @transform_17, window_bounds = array<i64: 1, 32>}, {pipeline_mode = #tpu.pipeline_mode<synchronous>, transform_indices = @transform_18, window_bounds = array<i64: 1, 32>}, {transform_indices = @transform_19, window_bounds = array<i64: 1, 8, 32>}]} {
    %c0 = arith.constant 0 : index
    %c0_0 = arith.constant 0 : index
    %c0_1 = arith.constant 0 : index
    %0 = vector.load %arg2[%c0, %c0_0, %c0_1] : memref<1x8x32xf32, #tpu.memory_space<vmem>>, vector<1x8x32xf32>
    %1 = vector.shape_cast %0 : vector<1x8x32xf32> to vector<8x32xf32>
    %c0_2 = arith.constant 0 : index
    %c0_3 = arith.constant 0 : index
    %c0_4 = arith.constant 0 : index
    %2 = vector.load %arg3[%c0_2, %c0_3, %c0_4] : memref<1x8x32xf32, #tpu.memory_space<vmem>>, vector<1x8x32xf32>
    %3 = vector.shape_cast %2 : vector<1x8x32xf32> to vector<8x32xf32>
    %c0_5 = arith.constant 0 : index
    %c0_6 = arith.constant 0 : index
    %c0_7 = arith.constant 0 : index
    %4 = vector.load %arg4[%c0_5, %c0_6, %c0_7] : memref<1x1x8xf32, #tpu.memory_space<vmem>>, vector<1x1x8xf32>
    %5 = vector.shape_cast %4 : vector<1x1x8xf32> to vector<1x8xf32>
    %cst = arith.constant 0.000000e+00 : f32
    %6 = vector.broadcast %cst : f32 to vector<1x8xf32>
    %7 = arith.cmpf oeq, %5, %6 : vector<1x8xf32>
    %8 = arith.truncf %1 : vector<8x32xf32> to vector<8x32xbf16>
    %9 = arith.truncf %3 : vector<8x32xf32> to vector<8x32xbf16>
    %c0_8 = arith.constant 0 : index
    %c0_9 = arith.constant 0 : index
    %10 = vector.load %arg5[%c0_8, %c0_9] : memref<32x64xf32, #tpu.memory_space<vmem>>, vector<32x64xf32>
    %11 = arith.truncf %10 : vector<32x64xf32> to vector<32x64xbf16>
    %cst_10 = arith.constant dense<0.000000e+00> : vector<8x64xf32>
    %12 = tpu.matmul %8, %11, %cst_10 {dimension_numbers = #tpu.dot_dimension_numbers<[1], [0], [0], [1], [0, 0, 1, 1], [], []>} : vector<8x32xbf16>, vector<32x64xbf16>, vector<8x64xf32> -> vector<8x64xf32>
    %c0_11 = arith.constant 0 : index
    %c0_12 = arith.constant 0 : index
    %13 = vector.load %arg6[%c0_11, %c0_12] : memref<1x64xf32, #tpu.memory_space<vmem>>, vector<1x64xf32>
    %14 = vector.broadcast %13 : vector<1x64xf32> to vector<8x64xf32>
    %15 = arith.addf %12, %14 : vector<8x64xf32>
    %c0_13 = arith.constant 0 : index
    %c0_14 = arith.constant 0 : index
    %16 = vector.load %arg7[%c0_13, %c0_14] : memref<32x64xf32, #tpu.memory_space<vmem>>, vector<32x64xf32>
    %17 = arith.truncf %16 : vector<32x64xf32> to vector<32x64xbf16>
    %cst_15 = arith.constant dense<0.000000e+00> : vector<8x64xf32>
    %18 = tpu.matmul %9, %17, %cst_15 {dimension_numbers = #tpu.dot_dimension_numbers<[1], [0], [0], [1], [0, 0, 1, 1], [], []>} : vector<8x32xbf16>, vector<32x64xbf16>, vector<8x64xf32> -> vector<8x64xf32>
    %c0_16 = arith.constant 0 : index
    %c0_17 = arith.constant 0 : index
    %19 = vector.load %arg8[%c0_16, %c0_17] : memref<1x64xf32, #tpu.memory_space<vmem>>, vector<1x64xf32>
    %20 = vector.broadcast %19 : vector<1x64xf32> to vector<8x64xf32>
    %21 = arith.addf %18, %20 : vector<8x64xf32>
    %c0_18 = arith.constant 0 : index
    %c0_19 = arith.constant 0 : index
    %22 = vector.load %arg9[%c0_18, %c0_19] : memref<32x64xf32, #tpu.memory_space<vmem>>, vector<32x64xf32>
    %23 = arith.truncf %22 : vector<32x64xf32> to vector<32x64xbf16>
    %cst_20 = arith.constant dense<0.000000e+00> : vector<8x64xf32>
    %24 = tpu.matmul %9, %23, %cst_20 {dimension_numbers = #tpu.dot_dimension_numbers<[1], [0], [0], [1], [0, 0, 1, 1], [], []>} : vector<8x32xbf16>, vector<32x64xbf16>, vector<8x64xf32> -> vector<8x64xf32>
    %c0_21 = arith.constant 0 : index
    %c0_22 = arith.constant 0 : index
    %25 = vector.load %arg10[%c0_21, %c0_22] : memref<1x64xf32, #tpu.memory_space<vmem>>, vector<1x64xf32>
    %26 = vector.broadcast %25 : vector<1x64xf32> to vector<8x64xf32>
    %27 = arith.addf %24, %26 : vector<8x64xf32>
    %c0_23 = arith.constant 0 : index
    %c0_24 = arith.constant 0 : index
    %28 = vector.load %arg11[%c0_23, %c0_24] : memref<64x32xf32, #tpu.memory_space<vmem>>, vector<64x32xf32>
    %cst_25 = arith.constant 0.000000e+00 : f32
    %29 = vector.broadcast %cst_25 : f32 to vector<8x32xf32>
    %30 = vector.extract_strided_slice %15 {offsets = [0, 0], sizes = [8, 32], strides = [1, 1]} : vector<8x64xf32> to vector<8x32xf32>
    %31 = arith.truncf %30 : vector<8x32xf32> to vector<8x32xbf16>
    %32 = vector.extract_strided_slice %21 {offsets = [0, 0], sizes = [8, 32], strides = [1, 1]} : vector<8x64xf32> to vector<8x32xf32>
    %33 = arith.truncf %32 : vector<8x32xf32> to vector<8x32xbf16>
    %34 = vector.extract_strided_slice %27 {offsets = [0, 0], sizes = [8, 32], strides = [1, 1]} : vector<8x64xf32> to vector<8x32xf32>
    %35 = arith.truncf %34 : vector<8x32xf32> to vector<8x32xbf16>
    %36 = tpu.transpose %33, [1, 0] : vector<8x32xbf16> -> vector<32x8xbf16>
    %cst_26 = arith.constant dense<0.000000e+00> : vector<8x8xf32>
    %37 = tpu.matmul %31, %36, %cst_26 {dimension_numbers = #tpu.dot_dimension_numbers<[1], [0], [0], [1], [0, 0, 1, 1], [], []>} : vector<8x32xbf16>, vector<32x8xbf16>, vector<8x8xf32> -> vector<8x8xf32>
    %cst_27 = arith.constant 0.176776692 : f32
    %38 = vector.broadcast %cst_27 : f32 to vector<8x8xf32>
    %39 = arith.mulf %37, %38 : vector<8x8xf32>
    %cst_28 = arith.constant -1.000000e+04 : f32
    %40 = vector.shape_cast %7 : vector<1x8xi1> to vector<1x8xi1>
    %41 = vector.broadcast %40 : vector<1x8xi1> to vector<8x8xi1>
    %42 = vector.broadcast %cst_28 : f32 to vector<8x8xf32>
    %43 = arith.select %41, %42, %39 : vector<8x8xi1>, vector<8x8xf32>
    %cst_29 = arith.constant dense<0xFF800000> : vector<8xf32>
    %44 = vector.multi_reduction <maximumf>, %43, %cst_29 [1] : vector<8x8xf32> to vector<8xf32>
    %45 = vector.shape_cast %44 : vector<8xf32> to vector<8x1xf32>
    %46 = vector.broadcast %45 : vector<8x1xf32> to vector<8x8xf32>
    %47 = arith.subf %43, %46 : vector<8x8xf32>
    %48 = math.exp %47 : vector<8x8xf32>
    %cst_30 = arith.constant dense<0.000000e+00> : vector<8xf32>
    %49 = vector.multi_reduction <add>, %48, %cst_30 [1] : vector<8x8xf32> to vector<8xf32>
    %50 = vector.shape_cast %49 : vector<8xf32> to vector<8x1xf32>
    %51 = tpu.reciprocal %50 {approx = true} : vector<8x1xf32> -> vector<8x1xf32>
    %52 = vector.broadcast %51 : vector<8x1xf32> to vector<8x8xf32>
    %53 = arith.mulf %48, %52 : vector<8x8xf32>
    %54 = arith.truncf %53 : vector<8x8xf32> to vector<8x8xbf16>
    %cst_31 = arith.constant dense<0.000000e+00> : vector<8x32xf32>
    %55 = tpu.matmul %54, %35, %cst_31 {dimension_numbers = #tpu.dot_dimension_numbers<[1], [0], [0], [1], [0, 0, 1, 1], [], []>} : vector<8x8xbf16>, vector<8x32xbf16>, vector<8x32xf32> -> vector<8x32xf32>
    %56 = arith.truncf %55 : vector<8x32xf32> to vector<8x32xbf16>
    %57 = vector.extract_strided_slice %28 {offsets = [0, 0], sizes = [32, 32], strides = [1, 1]} : vector<64x32xf32> to vector<32x32xf32>
    %58 = arith.truncf %57 : vector<32x32xf32> to vector<32x32xbf16>
    %cst_32 = arith.constant dense<0.000000e+00> : vector<8x32xf32>
    %59 = tpu.matmul %56, %58, %cst_32 {dimension_numbers = #tpu.dot_dimension_numbers<[1], [0], [0], [1], [0, 0, 1, 1], [], []>} : vector<8x32xbf16>, vector<32x32xbf16>, vector<8x32xf32> -> vector<8x32xf32>
    %60 = arith.addf %29, %59 : vector<8x32xf32>
    %61 = vector.extract_strided_slice %15 {offsets = [0, 32], sizes = [8, 32], strides = [1, 1]} : vector<8x64xf32> to vector<8x32xf32>
    %62 = arith.truncf %61 : vector<8x32xf32> to vector<8x32xbf16>
    %63 = vector.extract_strided_slice %21 {offsets = [0, 32], sizes = [8, 32], strides = [1, 1]} : vector<8x64xf32> to vector<8x32xf32>
    %64 = arith.truncf %63 : vector<8x32xf32> to vector<8x32xbf16>
    %65 = vector.extract_strided_slice %27 {offsets = [0, 32], sizes = [8, 32], strides = [1, 1]} : vector<8x64xf32> to vector<8x32xf32>
    %66 = arith.truncf %65 : vector<8x32xf32> to vector<8x32xbf16>
    %67 = tpu.transpose %64, [1, 0] : vector<8x32xbf16> -> vector<32x8xbf16>
    %cst_33 = arith.constant dense<0.000000e+00> : vector<8x8xf32>
    %68 = tpu.matmul %62, %67, %cst_33 {dimension_numbers = #tpu.dot_dimension_numbers<[1], [0], [0], [1], [0, 0, 1, 1], [], []>} : vector<8x32xbf16>, vector<32x8xbf16>, vector<8x8xf32> -> vector<8x8xf32>
    %cst_34 = arith.constant 0.176776692 : f32
    %69 = vector.broadcast %cst_34 : f32 to vector<8x8xf32>
    %70 = arith.mulf %68, %69 : vector<8x8xf32>
    %cst_35 = arith.constant -1.000000e+04 : f32
    %71 = vector.shape_cast %7 : vector<1x8xi1> to vector<1x8xi1>
    %72 = vector.broadcast %71 : vector<1x8xi1> to vector<8x8xi1>
    %73 = vector.broadcast %cst_35 : f32 to vector<8x8xf32>
    %74 = arith.select %72, %73, %70 : vector<8x8xi1>, vector<8x8xf32>
    %cst_36 = arith.constant dense<0xFF800000> : vector<8xf32>
    %75 = vector.multi_reduction <maximumf>, %74, %cst_36 [1] : vector<8x8xf32> to vector<8xf32>
    %76 = vector.shape_cast %75 : vector<8xf32> to vector<8x1xf32>
    %77 = vector.broadcast %76 : vector<8x1xf32> to vector<8x8xf32>
    %78 = arith.subf %74, %77 : vector<8x8xf32>
    %79 = math.exp %78 : vector<8x8xf32>
    %cst_37 = arith.constant dense<0.000000e+00> : vector<8xf32>
    %80 = vector.multi_reduction <add>, %79, %cst_37 [1] : vector<8x8xf32> to vector<8xf32>
    %81 = vector.shape_cast %80 : vector<8xf32> to vector<8x1xf32>
    %82 = tpu.reciprocal %81 {approx = true} : vector<8x1xf32> -> vector<8x1xf32>
    %83 = vector.broadcast %82 : vector<8x1xf32> to vector<8x8xf32>
    %84 = arith.mulf %79, %83 : vector<8x8xf32>
    %85 = arith.truncf %84 : vector<8x8xf32> to vector<8x8xbf16>
    %cst_38 = arith.constant dense<0.000000e+00> : vector<8x32xf32>
    %86 = tpu.matmul %85, %66, %cst_38 {dimension_numbers = #tpu.dot_dimension_numbers<[1], [0], [0], [1], [0, 0, 1, 1], [], []>} : vector<8x8xbf16>, vector<8x32xbf16>, vector<8x32xf32> -> vector<8x32xf32>
    %87 = arith.truncf %86 : vector<8x32xf32> to vector<8x32xbf16>
    %88 = vector.extract_strided_slice %28 {offsets = [32, 0], sizes = [32, 32], strides = [1, 1]} : vector<64x32xf32> to vector<32x32xf32>
    %89 = arith.truncf %88 : vector<32x32xf32> to vector<32x32xbf16>
    %cst_39 = arith.constant dense<0.000000e+00> : vector<8x32xf32>
    %90 = tpu.matmul %87, %89, %cst_39 {dimension_numbers = #tpu.dot_dimension_numbers<[1], [0], [0], [1], [0, 0, 1, 1], [], []>} : vector<8x32xbf16>, vector<32x32xbf16>, vector<8x32xf32> -> vector<8x32xf32>
    %91 = arith.addf %60, %90 : vector<8x32xf32>
    %c0_40 = arith.constant 0 : index
    %c0_41 = arith.constant 0 : index
    %92 = vector.load %arg12[%c0_40, %c0_41] : memref<1x32xf32, #tpu.memory_space<vmem>>, vector<1x32xf32>
    %93 = vector.broadcast %92 : vector<1x32xf32> to vector<8x32xf32>
    %94 = arith.addf %91, %93 : vector<8x32xf32>
    %95 = arith.addf %94, %1 : vector<8x32xf32>
    %cst_42 = arith.constant dense<0.000000e+00> : vector<8xf32>
    %96 = vector.multi_reduction <add>, %95, %cst_42 [1] : vector<8x32xf32> to vector<8xf32>
    %97 = vector.shape_cast %96 : vector<8xf32> to vector<8x1xf32>
    %cst_43 = arith.constant 3.200000e+01 : f32
    %98 = vector.broadcast %cst_43 : f32 to vector<8x1xf32>
    %99 = arith.divf %97, %98 : vector<8x1xf32>
    %100 = vector.broadcast %99 : vector<8x1xf32> to vector<8x32xf32>
    %101 = arith.subf %95, %100 : vector<8x32xf32>
    %102 = arith.mulf %101, %101 : vector<8x32xf32>
    %cst_44 = arith.constant dense<0.000000e+00> : vector<8xf32>
    %103 = vector.multi_reduction <add>, %102, %cst_44 [1] : vector<8x32xf32> to vector<8xf32>
    %104 = vector.shape_cast %103 : vector<8xf32> to vector<8x1xf32>
    %cst_45 = arith.constant 3.200000e+01 : f32
    %105 = vector.broadcast %cst_45 : f32 to vector<8x1xf32>
    %106 = arith.divf %104, %105 : vector<8x1xf32>
    %107 = vector.broadcast %99 : vector<8x1xf32> to vector<8x32xf32>
    %108 = arith.subf %95, %107 : vector<8x32xf32>
    %cst_46 = arith.constant 9.99999974E-6 : f32
    %109 = vector.broadcast %cst_46 : f32 to vector<8x1xf32>
    %110 = arith.addf %106, %109 : vector<8x1xf32>
    %111 = math.rsqrt %110 : vector<8x1xf32>
    %112 = vector.broadcast %111 : vector<8x1xf32> to vector<8x32xf32>
    %113 = arith.mulf %108, %112 : vector<8x32xf32>
    %c0_47 = arith.constant 0 : index
    %c0_48 = arith.constant 0 : index
    %114 = vector.load %arg13[%c0_47, %c0_48] : memref<1x32xf32, #tpu.memory_space<vmem>>, vector<1x32xf32>
    %115 = vector.broadcast %114 : vector<1x32xf32> to vector<8x32xf32>
    %116 = arith.mulf %113, %115 : vector<8x32xf32>
    %c0_49 = arith.constant 0 : index
    %c0_50 = arith.constant 0 : index
    %117 = vector.load %arg14[%c0_49, %c0_50] : memref<1x32xf32, #tpu.memory_space<vmem>>, vector<1x32xf32>
    %118 = vector.broadcast %117 : vector<1x32xf32> to vector<8x32xf32>
    %119 = arith.addf %116, %118 : vector<8x32xf32>
    %c0_51 = arith.constant 0 : index
    %c0_52 = arith.constant 0 : index
    %120 = vector.load %arg15[%c0_51, %c0_52] : memref<32x64xf32, #tpu.memory_space<vmem>>, vector<32x64xf32>
    %c0_53 = arith.constant 0 : index
    %c0_54 = arith.constant 0 : index
    %121 = vector.load %arg17[%c0_53, %c0_54] : memref<64x32xf32, #tpu.memory_space<vmem>>, vector<64x32xf32>
    %c0_55 = arith.constant 0 : index
    %c0_56 = arith.constant 0 : index
    %122 = vector.load %arg16[%c0_55, %c0_56] : memref<1x64xf32, #tpu.memory_space<vmem>>, vector<1x64xf32>
    %123 = arith.truncf %119 : vector<8x32xf32> to vector<8x32xbf16>
    %cst_57 = arith.constant 0.000000e+00 : f32
    %124 = vector.broadcast %cst_57 : f32 to vector<8x32xf32>
    %125 = arith.truncf %120 : vector<32x64xf32> to vector<32x64xbf16>
    %cst_58 = arith.constant dense<0.000000e+00> : vector<8x64xf32>
    %126 = tpu.matmul %123, %125, %cst_58 {dimension_numbers = #tpu.dot_dimension_numbers<[1], [0], [0], [1], [0, 0, 1, 1], [], []>} : vector<8x32xbf16>, vector<32x64xbf16>, vector<8x64xf32> -> vector<8x64xf32>
    %127 = vector.broadcast %122 : vector<1x64xf32> to vector<8x64xf32>
    %128 = arith.addf %126, %127 : vector<8x64xf32>
    %cst_59 = arith.constant 0.000000e+00 : f32
    %129 = vector.broadcast %cst_59 : f32 to vector<8x64xf32>
    %130 = arith.maximumf %128, %129 : vector<8x64xf32>
    %131 = arith.truncf %130 : vector<8x64xf32> to vector<8x64xbf16>
    %132 = arith.truncf %121 : vector<64x32xf32> to vector<64x32xbf16>
    %cst_60 = arith.constant dense<0.000000e+00> : vector<8x32xf32>
    %133 = tpu.matmul %131, %132, %cst_60 {dimension_numbers = #tpu.dot_dimension_numbers<[1], [0], [0], [1], [0, 0, 1, 1], [], []>} : vector<8x64xbf16>, vector<64x32xbf16>, vector<8x32xf32> -> vector<8x32xf32>
    %134 = arith.addf %124, %133 : vector<8x32xf32>
    %c0_61 = arith.constant 0 : index
    %c0_62 = arith.constant 0 : index
    %135 = vector.load %arg18[%c0_61, %c0_62] : memref<1x32xf32, #tpu.memory_space<vmem>>, vector<1x32xf32>
    %136 = vector.broadcast %135 : vector<1x32xf32> to vector<8x32xf32>
    %137 = arith.addf %134, %136 : vector<8x32xf32>
    %138 = arith.addf %137, %119 : vector<8x32xf32>
    %cst_63 = arith.constant dense<0.000000e+00> : vector<8xf32>
    %139 = vector.multi_reduction <add>, %138, %cst_63 [1] : vector<8x32xf32> to vector<8xf32>
    %140 = vector.shape_cast %139 : vector<8xf32> to vector<8x1xf32>
    %cst_64 = arith.constant 3.200000e+01 : f32
    %141 = vector.broadcast %cst_64 : f32 to vector<8x1xf32>
    %142 = arith.divf %140, %141 : vector<8x1xf32>
    %143 = vector.broadcast %142 : vector<8x1xf32> to vector<8x32xf32>
    %144 = arith.subf %138, %143 : vector<8x32xf32>
    %145 = arith.mulf %144, %144 : vector<8x32xf32>
    %cst_65 = arith.constant dense<0.000000e+00> : vector<8xf32>
    %146 = vector.multi_reduction <add>, %145, %cst_65 [1] : vector<8x32xf32> to vector<8xf32>
    %147 = vector.shape_cast %146 : vector<8xf32> to vector<8x1xf32>
    %cst_66 = arith.constant 3.200000e+01 : f32
    %148 = vector.broadcast %cst_66 : f32 to vector<8x1xf32>
    %149 = arith.divf %147, %148 : vector<8x1xf32>
    %150 = vector.broadcast %142 : vector<8x1xf32> to vector<8x32xf32>
    %151 = arith.subf %138, %150 : vector<8x32xf32>
    %cst_67 = arith.constant 9.99999974E-6 : f32
    %152 = vector.broadcast %cst_67 : f32 to vector<8x1xf32>
    %153 = arith.addf %149, %152 : vector<8x1xf32>
    %154 = math.rsqrt %153 : vector<8x1xf32>
    %155 = vector.broadcast %154 : vector<8x1xf32> to vector<8x32xf32>
    %156 = arith.mulf %151, %155 : vector<8x32xf32>
    %c0_68 = arith.constant 0 : index
    %c0_69 = arith.constant 0 : index
    %157 = vector.load %arg19[%c0_68, %c0_69] : memref<1x32xf32, #tpu.memory_space<vmem>>, vector<1x32xf32>
    %158 = vector.broadcast %157 : vector<1x32xf32> to vector<8x32xf32>
    %159 = arith.mulf %156, %158 : vector<8x32xf32>
    %c0_70 = arith.constant 0 : index
    %c0_71 = arith.constant 0 : index
    %160 = vector.load %arg20[%c0_70, %c0_71] : memref<1x32xf32, #tpu.memory_space<vmem>>, vector<1x32xf32>
    %161 = vector.broadcast %160 : vector<1x32xf32> to vector<8x32xf32>
    %162 = arith.addf %159, %161 : vector<8x32xf32>
    %c0_72 = arith.constant 0 : index
    %c0_73 = arith.constant 0 : index
    %c0_74 = arith.constant 0 : index
    %163 = vector.load %arg21[%c0_72, %c0_73, %c0_74] : memref<1x8x32xf32, #tpu.memory_space<vmem>>, vector<1x8x32xf32>
    %164 = vector.shape_cast %163 : vector<1x8x32xf32> to vector<8x32xf32>
    %165 = vector.shape_cast %162 : vector<8x32xf32> to vector<1x8x32xf32>
    tpu.vector_store %arg21[%c0_72, %c0_73, %c0_74], %165 {strides = array<i32>} : memref<1x8x32xf32, #tpu.memory_space<vmem>>, vector<1x8x32xf32>,
    return
  }
  func.func @transform_0(%arg0: i32, %arg1: i32) -> (i32, i32, i32) {
    %c0_i32 = arith.constant 0 : i32
    %c0_i32_0 = arith.constant 0 : i32
    return %arg0, %arg1, %c0_i32 : i32, i32, i32
  }
  func.func @transform_1(%arg0: i32, %arg1: i32) -> (i32, i32, i32) {
    %c0_i32 = arith.constant 0 : i32
    %c0_i32_0 = arith.constant 0 : i32
    %c0_i32_1 = arith.constant 0 : i32
    return %arg0, %c0_i32, %c0_i32_0 : i32, i32, i32
  }
  func.func @transform_2(%arg0: i32, %arg1: i32) -> (i32, i32, i32) {
    %c0_i32 = arith.constant 0 : i32
    %c0_i32_0 = arith.constant 0 : i32
    %c0_i32_1 = arith.constant 0 : i32
    return %arg0, %c0_i32, %c0_i32_0 : i32, i32, i32
  }
  func.func @transform_3(%arg0: i32, %arg1: i32) -> (i32, i32) {
    %c0_i32 = arith.constant 0 : i32
    %c0_i32_0 = arith.constant 0 : i32
    %c0_i32_1 = arith.constant 0 : i32
    return %c0_i32, %c0_i32_0 : i32, i32
  }
  func.func @transform_4(%arg0: i32, %arg1: i32) -> (i32, i32) {
    %c0_i32 = arith.constant 0 : i32
    %c0_i32_0 = arith.constant 0 : i32
    %c0_i32_1 = arith.constant 0 : i32
    return %c0_i32, %c0_i32_0 : i32, i32
  }
  func.func @transform_5(%arg0: i32, %arg1: i32) -> (i32, i32) {
    %c0_i32 = arith.constant 0 : i32
    %c0_i32_0 = arith.constant 0 : i32
    %c0_i32_1 = arith.constant 0 : i32
    return %c0_i32, %c0_i32_0 : i32, i32
  }
  func.func @transform_6(%arg0: i32, %arg1: i32) -> (i32, i32) {
    %c0_i32 = arith.constant 0 : i32
    %c0_i32_0 = arith.constant 0 : i32
    %c0_i32_1 = arith.constant 0 : i32
    return %c0_i32, %c0_i32_0 : i32, i32
  }
  func.func @transform_7(%arg0: i32, %arg1: i32) -> (i32, i32) {
    %c0_i32 = arith.constant 0 : i32
    %c0_i32_0 = arith.constant 0 : i32
    %c0_i32_1 = arith.constant 0 : i32
    return %c0_i32, %c0_i32_0 : i32, i32
  }
  func.func @transform_8(%arg0: i32, %arg1: i32) -> (i32, i32) {
    %c0_i32 = arith.constant 0 : i32
    %c0_i32_0 = arith.constant 0 : i32
    %c0_i32_1 = arith.constant 0 : i32
    return %c0_i32, %c0_i32_0 : i32, i32
  }
  func.func @transform_9(%arg0: i32, %arg1: i32) -> (i32, i32) {
    %c0_i32 = arith.constant 0 : i32
    %c0_i32_0 = arith.constant 0 : i32
    %c0_i32_1 = arith.constant 0 : i32
    return %c0_i32, %c0_i32_0 : i32, i32
  }
  func.func @transform_10(%arg0: i32, %arg1: i32) -> (i32, i32) {
    %c0_i32 = arith.constant 0 : i32
    %c0_i32_0 = arith.constant 0 : i32
    %c0_i32_1 = arith.constant 0 : i32
    return %c0_i32, %c0_i32_0 : i32, i32
  }
  func.func @transform_11(%arg0: i32, %arg1: i32) -> (i32, i32) {
    %c0_i32 = arith.constant 0 : i32
    %c0_i32_0 = arith.constant 0 : i32
    %c0_i32_1 = arith.constant 0 : i32
    return %c0_i32, %c0_i32_0 : i32, i32
  }
  func.func @transform_12(%arg0: i32, %arg1: i32) -> (i32, i32) {
    %c0_i32 = arith.constant 0 : i32
    %c0_i32_0 = arith.constant 0 : i32
    %c0_i32_1 = arith.constant 0 : i32
    return %c0_i32, %c0_i32_0 : i32, i32
  }
  func.func @transform_13(%arg0: i32, %arg1: i32) -> (i32, i32) {
    %c0_i32 = arith.constant 0 : i32
    %c0_i32_0 = arith.constant 0 : i32
    %c0_i32_1 = arith.constant 0 : i32
    return %c0_i32, %c0_i32_0 : i32, i32
  }
  func.func @transform_14(%arg0: i32, %arg1: i32) -> (i32, i32) {
    %c0_i32 = arith.constant 0 : i32
    %c0_i32_0 = arith.constant 0 : i32
    %c0_i32_1 = arith.constant 0 : i32
    return %c0_i32, %c0_i32_0 : i32, i32
  }
  func.func @transform_15(%arg0: i32, %arg1: i32) -> (i32, i32) {
    %c0_i32 = arith.constant 0 : i32
    %c0_i32_0 = arith.constant 0 : i32
    %c0_i32_1 = arith.constant 0 : i32
    return %c0_i32, %c0_i32_0 : i32, i32
  }
  func.func @transform_16(%arg0: i32, %arg1: i32) -> (i32, i32) {
    %c0_i32 = arith.constant 0 : i32
    %c0_i32_0 = arith.constant 0 : i32
    %c0_i32_1 = arith.constant 0 : i32
    return %c0_i32, %c0_i32_0 : i32, i32
  }
  func.func @transform_17(%arg0: i32, %arg1: i32) -> (i32, i32) {
    %c0_i32 = arith.constant 0 : i32
    %c0_i32_0 = arith.constant 0 : i32
    %c0_i32_1 = arith.constant 0 : i32
    return %c0_i32, %c0_i32_0 : i32, i32
  }
  func.func @transform_18(%arg0: i32, %arg1: i32) -> (i32, i32) {
    %c0_i32 = arith.constant 0 : i32
    %c0_i32_0 = arith.constant 0 : i32
    %c0_i32_1 = arith.constant 0 : i32
    return %c0_i32, %c0_i32_0 : i32, i32
  }
  func.func @transform_19(%arg0: i32, %arg1: i32) -> (i32, i32, i32) {
    %c0_i32 = arith.constant 0 : i32
    %c0_i32_0 = arith.constant 0 : i32
    return %arg0, %arg1, %c0_i32 : i32, i32, i32
  }
}

</mosaic_0001>

<bundles_post_ra>
// kernel: tpu_custom_call.1
= control target key start
LH: loop header
LB: loop body
LE: loop exit
PB: predicated region body
PF: predicated region fallthrough
CT: control target
= control target key end

     0   :  { %s2469_s0 = inlined_call_operand.vmem [shape: f32[2,8,32], index: 0, kind: input, shape index: {}]   ;;  %s2470_s1 = inlined_call_operand.vmem [shape: f32[2,8,32], index: 1, kind: input, shape index: {}]   ;;  %s2471_s2 = inlined_call_operand.vmem [shape: f32[2,1,8], index: 2, kind: input, shape index: {}]   ;;  %s2472_s3 = inlined_call_operand.vmem [shape: f32[32,64], index: 3, kind: input, shape index: {}]   ;;  %s2473_s4 = inlined_call_operand.hbm [shape: f32[1,64], index: 4, kind: input, shape index: {}]   ;;  %s2474_s5 = inlined_call_operand.vmem [shape: f32[32,64], index: 5, kind: input, shape index: {}]   ;;  %s2475_s6 = inlined_call_operand.hbm [shape: f32[1,64], index: 6, kind: input, shape index: {}]   ;;  %s2476_s7 = inlined_call_operand.vmem [shape: f32[32,64], index: 7, kind: input, shape index: {}]   ;;  %s2477_s8 = inlined_call_operand.hbm [shape: f32[1,64], index: 8, kind: input, shape index: {}]   ;;  %s2478_s9 = inlined_call_operand.vmem [shape: f32[64,32], index: 9, kind: input, shape index: {}]   ;;  %s2479_s10 = inlined_call_operand.vmem [shape: f32[1,32], index: 10, kind: input, shape index: {}]   ;;  %s2480_s11 = inlined_call_operand.vmem [shape: f32[1,32], index: 11, kind: input, shape index: {}]   ;;  %s2481_s12 = inlined_call_operand.vmem [shape: f32[1,32], index: 12, kind: input, shape index: {}]   ;;  %s2482_s13 = inlined_call_operand.vmem [shape: f32[32,64], index: 13, kind: input, shape index: {}]   ;;  %s2483_s14 = inlined_call_operand.vmem [shape: f32[1,64], index: 14, kind: input, shape index: {}]   ;;  %s2484_s15 = inlined_call_operand.vmem [shape: f32[64,32], index: 15, kind: input, shape index: {}]   ;;  %s2485_s16 = inlined_call_operand.vmem [shape: f32[1,32], index: 16, kind: input, shape index: {}]   ;;  %s2486_s17 = inlined_call_operand.vmem [shape: f32[1,32], index: 17, kind: input, shape index: {}]   ;;  %s2487_s18 = inlined_call_operand.vmem [shape: f32[1,32], index: 18, kind: input, shape index: {}]   ;;  %s2488_s19 = inlined_call_operand.hbm [shape: f32[2,8,32], index: 19, kind: output, shape index: {}]  }
   0x1   :  { %2502 = sst [smem:[#allocation19_spill]] %s2469_s0 }
   0x2   :  { %2503 = sst [smem:[#allocation20_spill]] %s2470_s1 }
   0x3   :  { %2504 = sst [smem:[#allocation21_spill]] %s2471_s2 }
   0x4   :  { %2505 = sst [smem:[#allocation22_spill]] %s2472_s3 }
   0x5   :  { %2506 = sst [smem:[#allocation23_spill]] %s2475_s6 }
   0x6   :  { %2507 = sst [smem:[#allocation24_spill]] %s2486_s17 }
   0x7   :  { %2508 = sst [smem:[#allocation25_spill]] %s2487_s18 }
   0x8   :  { %2509 = sst [smem:[#allocation26_spill]] %s2488_s19 }
   0x9   :  { %24 = vsyncpa [#allocation3], 0 }
   0xa   :  { %25 = vsyncpa [#allocation6], 0 }
   0xb   :  { %26 = vsyncpa [#allocation4], 0 }
   0xc   :  { %28 = vsyncpa [#allocation4 + $0x1], 0  ;;  %s2063_s0 = smov 0   ;;  %s2065_s30 = smov 0  }
   0xd   :  { %s2067_s20 = smov 0   ;;  %s2069_s21 = smov 0  }
   0xe   :  { %s2071_s1 = smov 0   ;;  %s2073_s22 = smov 0  }
   0xf LB: > { %2510 = sst [smem:[#allocation12_spill]] %s1933_s0  ;;  %s1527_s2 = sadd.s32 4294967295, %s1953_s22   ;;  %s1953_s22 = sphi %s2073_s22, %s34_s22   ;;  %s1949_s1 = sphi %s2071_s1, %s2541_s1   ;;  %s1945_s21 = sphi %s2069_s21, %s2540_s21   ;;  %s1941_s20 = sphi %s2067_s20, %s2539_s20   ;;  %s1937_s30 = sphi %s2065_s30, %s2543_s30   ;;  %s1933_s0 = sphi %s2063_s0, %s2542_s0  }
  0x10   : > { %2511 = sst [smem:[#allocation13_spill]] %s1941_s20  ;;  %s1528_s23 = sadd.s32 4294967294, %s1953_s22  }
  0x11   : > { %2512 = sst [smem:[#allocation14_spill]] %s1949_s1  ;;  %s46_s24 = sadd.s32 1, %s1949_s1 }
  0x12   : > { %2513 = sst [smem:[#allocation15_spill]] %s1953_s22  ;;  %s471_s25 = sadd.s32 1, %s1941_s20 }
  0x13   : > { %p48_p0 = scmp.ge.s32.totalorder %s46_s24, 2  ;;  %p481_p1 = scmp.ne.s32.totalorder %s1941_s20, %s1937_s30 }
  0x14   : > { %p482_p2 = scmp.eq.s32.totalorder %s1527_s2, 1  ;;  %p487_p3 = scmp.ne.s32.totalorder %s1937_s30, %s1933_s0 }
  0x15   : > { %s2545_s24 = smov (%p48_p0, %s46_s24), 0  ;;  %p488_p5 = scmp.eq.s32.totalorder %s1528_s23, 1 }
  0x16   : > { %2514 = sst [smem:[#allocation16_spill]] %s2545_s24  ;;  %p2103_p4 = por %p482_p2, %p481_p1 }
  0x17   : > { %s466_s26 = ssub.s32 %s1949_s1, %s2545_s24  ;;  %p1529_p6 = scmp.ge.s32.totalorder %s1953_s22, 1 }
  0x18   : > { %s2515_s3 = scalar_select %p2103_p4, 1, 0 }
  0x19   : > { %p469_p7 = scmp.eq.s32.totalorder %s466_s26, 0  ;;  %p2110_p8 = por %p488_p5, %p487_p3 }
  0x1a   : > { %p495_p9 = scmp.lt.s32.totalorder %s1953_s22, 3  ;;  %p2122_p11 = scmp.eq.s32.totalorder %s1527_s2, 0 }
  0x1b   : > { %s2516_s27 = scalar_select %p2110_p8, 1, 0 }
  0x1c   : > { %s2116_s28 = scalar_select %p469_p7, %s1941_s20, %s471_s25  }
  0x1d   : > { %2517 = sst [smem:[#allocation17_spill]] %s2516_s27  ;;  %p2118_p10 = pnand %p1529_p6, %p495_p9 }
  0x1e   : > { %2518 = sst [smem:[#allocation18_spill]] %s2116_s28  ;;  %s1955_s23 = smov [#allocation5]  }
  0x1f   : > { %s2519_s29 = scalar_select %p2118_p10, 1, 0 }
  0x20   : > { %s2520_s0 = scalar_select %p2122_p11, 1, 0 }
  0x21   : > { %p1695_p12 = pneg %p2118_p10  ;;  %s525_s26 = sshll.u32 %s1955_s23, 4  ;;  %s526_s26 = int_to_ptr.vmem [resolvable:$true] %s525_s26 }
  0x22   : > { %s1956_s25 = smov [#allocation2]   ;;  %s2522_s6 = sld [smem:[#allocation23_spill]] }
  0x23   : > { %p2130_p13 = pnand %p2122_p11, %p1695_p12  ;;  %s511_s1 = sshll.u32 %s1956_s25, 4  ;;  %s2134_s1 = int_to_ptr.vmem [resolvable:$true] %s511_s1 }
  0x25   : > { %p2144_p1 = pneg %p2130_p13 }
  0x28   : > { %s1783_s20 = scalar_lea.hbm %s2522_s6, 16 }
  0x29   : > { %p1784_p0 = scmp.ne.s32.totalorder %s2522_s6, %s1783_s20  ;;  %p1790_p5 = scmp.lt.u32.totalorder %s1783_s20, %s2522_s6 }
  0x2b   : > { %p1786_p2 = pnand %p2144_p1, %p1784_p0 }
  0x2d   : > { %p1787_p3 = pneg %p1786_p2 }
  0x2f   : > { %p1792_p6 = pnand %p1790_p5, %p1787_p3 }
  0x31   : > { %1795 = shalt.err (!%p1792_p6)
}
  0x32   : > { %s1796_s28 = scalar_lea.vmem %s526_s26, 16  ;;  %s1803_s22 = scalar_lea.vmem %s526_s26, 32 }
  0x33   : > { %p1797_p7 = scmp.ne.s32.totalorder %s526_s26, %s1796_s28  ;;  %p1804_p8 = scmp.lt.s32.totalorder %s526_s26, %s526_s26 }
  0x34   : > { %p1805_p4 = scmp.lt.s32.totalorder %s1803_s22, %s1796_s28 }
  0x35   : > { %p1799_p9 = pnand %p1797_p7, %p2144_p1 }
  0x36   : > { %p1806_p11 = por %p1805_p4, %p1804_p8 }
  0x37   : > { %p1800_p12 = pneg %p1799_p9 }
  0x39   : > { %p1807_p10 = pnand %p1806_p11, %p1800_p12 }
  0x3b   : > { %1810 = shalt.err (!%p1807_p10)
}
  0x3c   : > { %1701 = dma.hbm_to_vmem [thread:$0]  (!%p2130_p13), %s2522_s6, 16, %s526_s26, [#allocation6]  }
  0x3d   : > { %s1811_s25 = scalar_lea.hbm %s2473_s4, 16 }
  0x3e   : > { %p1812_p0 = scmp.ne.s32.totalorder %s2473_s4, %s1811_s25  ;;  %p1818_p8 = scmp.lt.u32.totalorder %s1811_s25, %s2473_s4 }
  0x40   : > { %p1814_p2 = pnand %p1812_p0, %p2144_p1 }
  0x42   : > { %p1815_p4 = pneg %p1814_p2 }
  0x44   : > { %p1820_p10 = pnand %p1818_p8, %p1815_p4 }
  0x46   : > { %1823 = shalt.err (!%p1820_p10)
}
  0x47   : > { %s1824_s26 = scalar_lea.vmem %s2134_s1, 16  ;;  %s1831_s17 = scalar_lea.vmem %s2134_s1, 32 }
  0x48   : > { %p1825_p11 = scmp.ne.s32.totalorder %s2134_s1, %s1824_s26  ;;  %p1832_p6 = scmp.lt.s32.totalorder %s2134_s1, %s2134_s1 }
  0x49   : > { %p1833_p7 = scmp.lt.s32.totalorder %s1831_s17, %s1824_s26 }
  0x4a   : > { %p1827_p3 = pnand %p1825_p11, %p2144_p1 }
  0x4b   : > { %p1834_p9 = por %p1833_p7, %p1832_p6 }
  0x4c   : > { %p1828_p5 = pneg %p1827_p3 }
  0x4e   : > { %p1835_p12 = pnand %p1834_p9, %p1828_p5 }
  0x50   : > { %1838 = shalt.err (!%p1835_p12)
}
  0x51   : > { %1698 = dma.hbm_to_vmem [thread:$0]  (!%p2130_p13), %s2473_s4, 16, %s2134_s1, [#allocation3]  }
  0x52   : > { %s1957_s2 = smov [#allocation7]   ;;  %s1839_s28 = scalar_lea.hbm %s2477_s8, 16 }
  0x53   : > { %s539_s19 = sshll.u32 %s1957_s2, 4  ;;  %p1840_p0 = scmp.ne.s32.totalorder %s2477_s8, %s1839_s28  ;;  %s540_s19 = int_to_ptr.vmem [resolvable:$true] %s539_s19 }
  0x54   : > { %p1846_p8 = scmp.lt.u32.totalorder %s1839_s28, %s2477_s8 }
  0x55   : > { %p1842_p2 = pnand %p1840_p0, %p2144_p1 }
  0x57   : > { %p1843_p4 = pneg %p1842_p2 }
  0x59   : > { %p1848_p10 = pnand %p1846_p8, %p1843_p4 }
  0x5b   : > { %1851 = shalt.err (!%p1848_p10)
}
  0x5c   : > { %s1852_s1 = scalar_lea.vmem %s540_s19, 16  ;;  %s1859_s18 = scalar_lea.vmem %s540_s19, 32 }
  0x5d   : > { %p1853_p11 = scmp.ne.s32.totalorder %s540_s19, %s1852_s1  ;;  %p1860_p6 = scmp.lt.s32.totalorder %s540_s19, %s540_s19 }
  0x5e   : > { %p1861_p7 = scmp.lt.s32.totalorder %s1859_s18, %s1852_s1 }
  0x5f   : > { %p1855_p3 = pnand %p1853_p11, %p2144_p1 }
  0x60   : > { %p1862_p9 = por %p1861_p7, %p1860_p6 }
  0x61   : > { %p1856_p5 = pneg %p1855_p3 }
  0x63   : > { %p1863_p12 = pnand %p1862_p9, %p1856_p5 }
  0x65   : > { %1866 = shalt.err (!%p1863_p12)
}
  0x66   : > { %1704 = dma.hbm_to_vmem [thread:$0]  (!%p2130_p13), %s2477_s8, 16, %s540_s19, [#allocation6]  }
  0x67   : > { %p2524_p0 = scmp.ne.s32.totalorder %s2519_s29, 0 }
  0x68   : > { %p2525_p2 = scmp.ne.s32.totalorder (!%p2524_p0), %s2520_s0, 0 }
  0x69   : > { %605 = sbr.rel (%p2524_p0) target bundleno = 2517 (0x9d5), region = 96 }
  0x70   : > { %1920 = dma.done.wait (%p2525_p2), [#allocation3], 16  }
  0x71   : > { %1922 = vsyncadd (%p2525_p2), [#allocation3], 4294967280 }
  0x72   : > { %1924 = dma.done.wait (%p2525_p2), [#allocation6], 32  }
  0x73   : > { %1926 = vsyncadd (%p2525_p2), [#allocation6], 4294967264  ;;  %p678_p1 = scmp.lt.s32.totalorder %s1945_s21, 1  ;;  %v1958_v0 = vmov 0.0   ;;  %vm1959_vm0 = vmmov 0   ;;  %s2526_s23 = sld [smem:[#allocation22_spill]]  ;;  %v924_v41 = vlaneseq }
  0x74   : > { %1597 = vmatprep.subr.bf16.mxu1 %v1958_v0  ;;  %1601 = vmatprep.mubr.msk.bf16.mxu1 %vm1959_vm0, %v1958_v0  ;;  %s2527_s17 = sld [smem:[#allocation19_spill]]  ;;  %v756_v8 = vld [vmem:[%s2474_s5] sm:$0xff]  ;;  %v757_v9 = vld [vmem:[%s2474_s5 + $0x8] sm:$0xff]  ;;  %vm712_vm1 = vcmask 261120   ;;  %s2528_s28 = sld [smem:[#allocation20_spill]]  ;;  %v758_v12 = vld [vmem:[%s2474_s5 + $0x10] sm:$0xff] }
  0x75   : > { %s2217_s6 = scalar_select %p678_p1, %s1945_s21, 1  ;;  %1613 = vmatprep.subr.bf16.mxu0 %v1958_v0  ;;  %1617 = vmatprep.mubr.msk.bf16.mxu0 %vm1959_vm0, %v1958_v0  ;;  %v760_v11 = vpack.c.bf16 %v757_v9, %v756_v8  ;;  %v759_v13 = vld [vmem:[%s2474_s5 + $0x18] sm:$0xff]  ;;  %v1543_v21 = vld [vmem:[#allocation5] ss:$0 sm:$0xff]  ;;  %v1541_v22 = vld [vmem:[#allocation2] ss:$0 sm:$0xff] }
  0x76   : > { %v761_v14 = vpack.c.bf16 %v759_v13, %v758_v12  ;;  %v812_v32 = vld [vmem:[%s2476_s7] sm:$0xff]  ;;  %v813_v33 = vld [vmem:[%s2476_s7 + $0x8] sm:$0xff]  ;;  %v814_v34 = vld [vmem:[%s2476_s7 + $0x10] sm:$0xff]  ;;  %v925_v43 = vshrl.u32 %v924_v41, 7  ;;  %v1961_v45 = vmov 0   ;;  %vm930_vm4 = vcmask 64512  }
  0x77   : > { %s1539_s0 = sshll.u32 %s2217_s6, 3  ;;  %v816_v35 = vpack.c.bf16 %v813_v33, %v812_v32  ;;  %v815_v36 = vld [vmem:[%s2476_s7 + $0x18] sm:$0xff]  ;;  %vm946_vm5 = vcmask 1043456   ;;  %vm1314_vm6 = vcmask 523264   ;;  %s675_s24 = sand.u32 1, %s1937_s30  }
  0x78   : > { %v817_v37 = vpack.c.bf16 %v815_v36, %v814_v34  ;;  %v926_v44 = vsub.s32 0, %v925_v43  ;;  %v867_v34 = vld [vmem:[%s2478_s9 + $0x10] sm:$0xff]  ;;  %s1538_s29 = sshll.u32 %s675_s24, 3  ;;  %s2530_s25 = sld [smem:[#allocation24_spill]] }
  0x79   : > { %v699_v1 = vld [vmem:[%s2526_s23] sm:$0xff]  ;;  %v700_v2 = vld [vmem:[%s2526_s23 + $0x8] sm:$0xff]  ;;  %v701_v3 = vld [vmem:[%s2526_s23 + $0x10] sm:$0xff]  ;;  %1614 = vmatpush3.bf16.msra.mxu0 %v816_v35  ;;  %s2531_s26 = sld [smem:[#allocation25_spill]]  ;;  %s2532_s2 = sld [smem:[#allocation26_spill]] }
  0x7a   : > { %s684_s1 = scalar_lea.vmem %s2527_s17, %s1539_s0  ;;  %v703_v4 = vpack.c.bf16 %v700_v2, %v699_v1  ;;  %v702_v5 = vld [vmem:[%s2526_s23 + $0x18] sm:$0xff]  ;;  %s688_s22 = scalar_lea.vmem %s2528_s28, %s1539_s0  ;;  %1615 = vmatprep.subr.bf16.mxu0 %v1958_v0  ;;  %v1545_v2 = vld [vmem:[#allocation7] ss:$0 sm:$0xff] }
  0x7b   : > { %v704_v6 = vpack.c.bf16 %v702_v5, %v701_v3  ;;  %v2238_v7 = vld [vmem:[%s684_s1] sm:$0xff]  ;;  %s1960_s0 = smov 96   ;;  %s2529_s17 = sld [smem:[#allocation21_spill]]  ;;  %v868_v35 = vld [vmem:[%s2478_s9 + $0x18] sm:$0xff] }
  0x7c   : > { %1598 = vmatpush3.bf16.msra.mxu1 %v703_v4  ;;  %v697_v10 = vpack.c.bf16 %v2238_v7, %v2238_v7  ;;  %v694_v15 = vld [vmem:[%s688_s22] sm:$0xff]  ;;  %v992_v36 = vpack.c.bf16 %v868_v35, %v867_v34  ;;  %s1390_s19 = scalar_lea.sflag [#allocation4], %s675_s24  ;;  %p2533_p4 = scmp.ne.s32.totalorder %s2515_s3, 0 }
  0x7d   : > { %1599 = vmatprep.subr.bf16.mxu1 %v1958_v0  ;;  %v698_v16 = vpack.c.bf16 %v694_v15, %v694_v15  ;;  %1616 = vmatpush3.bf16.msra.mxu0 %v817_v37  ;;  %v871_v37 = vld [vmem:[%s2478_s9 + $0x30] sm:$0xff] }
  0x7e   : > { %1627 = vmatprep.subr.bf16.mxu0 %v1958_v0 }
  0x80   : > { %1600 = vmatpush3.bf16.msra.mxu1 %v704_v6  ;;  %1618 = vmatmul.mubr.msk.bf16.vlgmr.msra.gmra.mrb[0].mxu0 %vm712_vm1, %v698_v16 }
  0x81   : > { %1605 = vmatprep.subr.bf16.mxu1 %v1958_v0  ;;  %1629 = vmatprep.mubr.msk.bf16.mxu0 %vm1959_vm0, %v1958_v0  ;;  %s691_s1 = scalar_lea.vmem %s2529_s17, %s2217_s6  ;;  %s1563_s17 = sshll.u32 %s1945_s21, 7 }
  0x82   : > { %v695_v42 = vld [vmem:[%s691_s1] sm:$0x1]  ;;  %s677_s1 = scalar_lea.vmem [#allocation8], %s1538_s29  ;;  %s1962_s21 = smov [#allocation8]  }
  0x83   : > { %1602 = vmatmul.mubr.msk.bf16.vlgmr.msra.gmra.mrb[0].mxu1 %vm712_vm1, %v697_v10  ;;  %vm696_vm2 = vcmp.eq.f32.partialorder %v695_v42, 0.0  ;;  %s1404_s6 = sshll.u32 %s677_s1, 4  ;;  %s1871_s29 = sshll.u32 %s1962_s21, 4  ;;  %s2423_s6 = int_to_ptr.vmem [resolvable:$true] %s1404_s6  ;;  %s1872_s29 = int_to_ptr.vmem [resolvable:$false] %s1871_s29 }
  0x84   : > { %1606 = vmatpush3.bf16.msra.mxu1 %v760_v11  ;;  %1609 = vmatprep.mubr.msk.bf16.mxu1 %vm1959_vm0, %v1958_v0  ;;  %v923_v46 = vsel %vm696_vm2, 1, %v1961_v45  ;;  %s1867_s20 = scalar_lea.vmem %s2423_s6, 128  ;;  %p1874_p11 = scmp.lt.s32.totalorder %s2423_s6, %s1872_s29 }
  0x85   : > { %1607 = vmatprep.subr.bf16.mxu1 %v1958_v0  ;;  %v927_v47 = vrot.slane %v923_v46, %v926_v44  ;;  %p1868_p13 = scmp.ne.s32.totalorder %s2423_s6, %s1867_s20 }
  0x87   : > { %vm928_vm3 = vcmp.eq.s32.totalorder %v927_v47, 1  ;;  %p1869_p8 = pnand %p1868_p13, %p2533_p4 }
  0x88   : > { %1608 = vmatpush3.bf16.msra.mxu1 %v761_v14 }
  0x89   : > { %1621 = vmatprep.subr.bf16.mxu1 %v1958_v0  ;;  %p1870_p10 = pneg %p1869_p8 }
  0x8b   : > { %1610 = vmatmul.mubr.msk.bf16.vlgmr.msra.gmra.mrb[4].mxu1 %vm712_vm1, %v698_v16 }
  0x8c   : > { %1623 = vmatprep.mubr.msk.bf16.mxu1 %vm1959_vm0, %v1958_v0 }
 0x153   : > { %v859_v3 = vpop.f32.mrb[0].mxu0 }
 0x154   : > { %v860_v4 = vadd.f32 %v1545_v2, %v859_v3  ;;  %v1619_v5 = vpop.f32.mrb[1].mxu0 }
 0x155   : > { %v862_v6 = vpop.f32.mrb[2].mxu0  ;;  %v1236_v5 = vld [vmem:[%s2482_s13] sm:$0xff] }
 0x156   : > { %v750_v17 = vpop.f32.mrb[0].mxu1  ;;  %v875_v8 = vpack.c.bf16 %v860_v4, %v860_v4  ;;  %v1620_v9 = vpop.f32.mrb[3].mxu0  ;;  %v1237_v6 = vld [vmem:[%s2482_s13 + $0x8] sm:$0xff] }
 0x157   : > { %v1603_v18 = vpop.f32.mrb[1].mxu1  ;;  %v751_v27 = vadd.f32 %v1541_v22, %v750_v17  ;;  %v869_v22 = vld [vmem:[%s2478_s9 + $0x20] sm:$0xff]  ;;  %v1239_v9 = vld [vmem:[%s2482_s13 + $0x18] sm:$0xff] }
 0x158   : > { %v753_v19 = vpop.f32.mrb[2].mxu1  ;;  %v948_v10 = vsel %vm946_vm5, %v875_v8, 0 }
 0x159   : > { %v1604_v20 = vpop.f32.mrb[3].mxu1  ;;  %v873_v31 = vpack.c.bf16 %v751_v27, %v751_v27  ;;  %1628 = vmatpush3.bf16.msra.mxu0 %v948_v10 }
 0x15a   : > { %1639 = vmatprep.subr.bf16.mxu0 %v1958_v0 }
 0x15e   : > { %v806_v23 = vpop.f32.mrb[4].mxu1 }
 0x15f   : > { %v807_v24 = vadd.f32 %v1543_v21, %v806_v23  ;;  %v1611_v25 = vpop.f32.mrb[5].mxu1  ;;  %v870_v23 = vld [vmem:[%s2478_s9 + $0x28] sm:$0xff] }
 0x160   : > { %v809_v26 = vpop.f32.mrb[6].mxu1 }
 0x161   : > { %v874_v28 = vpack.c.bf16 %v807_v24, %v807_v24  ;;  %v1612_v29 = vpop.f32.mrb[7].mxu1  ;;  %v1109_v24 = vpack.c.bf16 %v870_v23, %v869_v22  ;;  %v1555_v23 = vld [vmem:[%s2481_s12] ss:$0 sm:$0xff] }
 0x162   : > { %v866_v29 = vld [vmem:[%s2478_s9 + $0x8] sm:$0xff] }
 0x163   : > { %v880_v30 = vsel %vm712_vm1, %v874_v28, 0  ;;  %997 = vrot.lane.b32.xlu0 %v874_v28, %s1960_s0  ;;  %v865_v28 = vld [vmem:[%s2478_s9] sm:$0xff] }
 0x164   : > { %1622 = vmatpush3.bf16.xpose.msra.mxu1 %v880_v30  ;;  %v991_v32 = vpack.c.bf16 %v866_v29, %v865_v28  ;;  %v1245_v28 = vld [vmem:[%s2484_s15 + $0x28] sm:$0xff] }
 0x165   : > { %1633 = vmatprep.subr.bf16.mxu1 %v1958_v0 }
 0x167   : > { %994 = vrot.lane.b32.xlu0 %v873_v31, %s1960_s0 }
 0x16b   : > { %1624 = vmatmul.mubr.msk.bf16.vlgmr.msra.gmra.mrb[8].mxu1 %vm712_vm1, %v873_v31 }
 0x16c   : > { %1635 = vmatprep.mubr.msk.bf16.mxu1 %vm1959_vm0, %v1958_v0 }
 0x1d5   : > { %v998_v38 = vpop.permute.xlu0 %997 }
 0x1d6   : > { %v1003_v39 = vsel %vm712_vm1, %v998_v38, 0  ;;  %v872_v38 = vld [vmem:[%s2478_s9 + $0x38] sm:$0xff] }
 0x1d7   : > { %1634 = vmatpush3.bf16.xpose.msra.mxu1 %v1003_v39  ;;  %v1110_v39 = vpack.c.bf16 %v872_v38, %v871_v37 }
 0x1d8   : > { %1645 = vmatprep.subr.bf16.mxu1 %v1958_v0 }
 0x1d9   : > { %v995_v40 = vpop.permute.xlu0 %994 }
 0x1de   : > { %1636 = vmatmul.mubr.msk.bf16.vlgmr.msra.gmra.mrb[12].mxu1 %vm712_vm1, %v995_v40 }
 0x1df   : > { %1649 = vmatprep.mubr.msk.bf16.mxu1 %vm1959_vm0, %v1958_v0  ;;  %1646 = vmatpush3.bf16.msra.mxu1 %v1109_v24 }
 0x1e0   : > { %1647 = vmatprep.subr.bf16.mxu1 %v1958_v0 }
 0x1e3   : > { %1648 = vmatpush3.bf16.msra.mxu1 %v1110_v39 }
 0x1e4   : > { %1661 = vmatprep.subr.bf16.mxu1 %v1958_v0 }
 0x23e   : > { %v916_v48 = vpop.f32.mrb[8].mxu1 }
 0x23f   : > { %v922_v49 = vmul.f32 0.17677669, %v916_v48  ;;  %v1625_v50 = vpop.f32.mrb[9].mxu1 }
 0x240   : > { %v919_v51 = vpop.f32.mrb[10].mxu1 }
 0x241   : > { %v1626_v52 = vpop.f32.mrb[11].mxu1  ;;  %v929_v53 = vsel %vm928_vm3, -10000.0, %v922_v49 }
 0x242   : > { %v931_v54 = vsel %vm930_vm4, %v929_v53, -inf }
 0x243   : > { %932 = vmax.xlane.f32.xlu1 %v931_v54 }
 0x2b1   : > { %v1039_v55 = vpop.f32.mrb[12].mxu1 }
 0x2b2   : > { %v1045_v56 = vmul.f32 0.17677669, %v1039_v55  ;;  %v1637_v57 = vpop.f32.mrb[13].mxu1  ;;  %v1553_v55 = vld [vmem:[%s2479_s10] ss:$0 sm:$0xff] }
 0x2b3   : > { %v1042_v58 = vpop.f32.mrb[14].mxu1 }
 0x2b4   : > { %v1638_v59 = vpop.f32.mrb[15].mxu1  ;;  %v1046_v60 = vsel %vm928_vm3, -10000.0, %v1045_v56 }
 0x2b5   : > { %v1047_v61 = vsel %vm930_vm4, %v1046_v60, -inf }
 0x2b6   : > { %1048 = vmax.xlane.f32.xlu1 %v1047_v61 }
 0x2d0   : > { %v933_v62 = vpop.xlane.xlu1 %932 }
 0x2d1   : > { %v934_v63 = vsub.f32 %v929_v53, %v933_v62 }
 0x2d3   : > { %v935_v1 = vmul.f32 1.442695, %v934_v63 }
 0x2d5   : > { %1771 = vpow2.f32 %v935_v1 }
 0x2df   : > { %v1772_v11 = vpop.eup %1771 }
 0x2e0   : > { %v937_v12 = vsel %vm930_vm4, %v1772_v11, 0.0 }
 0x2e1   : > { %938 = vadd.xlane.f32.xlu0 %v937_v12  ;;  %v1241_v12 = vld [vmem:[%s2484_s15 + $0x8] sm:$0xff] }
 0x343   : > { %v1049_v13 = vpop.xlane.xlu1 %1048 }
 0x344   : > { %v1050_v14 = vsub.f32 %v1046_v60, %v1049_v13  ;;  %v1242_v13 = vld [vmem:[%s2484_s15 + $0x10] sm:$0xff] }
 0x346   : > { %v1051_v15 = vmul.f32 1.442695, %v1050_v14 }
 0x348   : > { %1773 = vpow2.f32 %v1051_v15  ;;  %v1243_v15 = vld [vmem:[%s2484_s15 + $0x18] sm:$0xff] }
 0x352   : > { %v1774_v16 = vpop.eup %1773 }
 0x353   : > { %v1053_v17 = vsel %vm930_vm4, %v1774_v16, 0.0 }
 0x354   : > { %1054 = vadd.xlane.f32.xlu1 %v1053_v17 }
 0x365   : > { %1060 = vrot.lane.b32.xlu1 %v875_v8, %s1960_s0  ;;  %v1250_v8 = vpack.c.bf16 %v1237_v6, %v1236_v5  ;;  %s2421_s0 = scalar_lea.hbm %s2532_s2, %s1563_s17 }
 0x36e   : > { %v939_v18 = vpop.xlane.xlu0 %938 }
 0x36f   : > { %1775 = vrcp.f32 %v939_v18 }
 0x379   : > { %v1776_v19 = vpop.eup %1775 }
 0x37a   : > { %v941_v20 = vmul.f32 %v1776_v19, %v1772_v11  ;;  %v1240_v11 = vld [vmem:[%s2484_s15] sm:$0xff] }
 0x37b   : > { %v1303_v14 = vpack.c.bf16 %v1241_v12, %v1240_v11 }
 0x37c   : > { %v942_v21 = vpack.c.bf16 %v941_v20, %v941_v20 }
 0x37e   : > { %1630 = vmatmul.mubr.msk.bf16.vlgmr.msra.gmra.mrb[4].mxu0 %vm930_vm4, %v942_v21  ;;  %v1554_v21 = vld [vmem:[%s2480_s11] ss:$0 sm:$0xff] }
 0x37f   : > { %1641 = vmatprep.mubr.msk.bf16.mxu0 %vm1959_vm0, %v1958_v0 }
 0x3e1   : > { %v1055_v25 = vpop.xlane.xlu1 %1054 }
 0x3e2   : > { %1777 = vrcp.f32 %v1055_v25 }
 0x3e5   : > { %v1061_v26 = vpop.permute.xlu1 %1060 }
 0x3e6   : > { %v1066_v27 = vsel %vm946_vm5, %v1061_v26, 0 }
 0x3e7   : > { %1640 = vmatpush3.bf16.msra.mxu0 %v1066_v27  ;;  %v1244_v27 = vld [vmem:[%s2484_s15 + $0x20] sm:$0xff] }
 0x3e8   : > { %1653 = vmatprep.subr.bf16.mxu0 %v1958_v0  ;;  %v1305_v29 = vpack.c.bf16 %v1245_v28, %v1244_v27 }
 0x3ec   : > { %v1778_v30 = vpop.eup %1777 }
 0x3ed   : > { %v1057_v31 = vmul.f32 %v1778_v30, %v1774_v16  ;;  %v1304_v16 = vpack.c.bf16 %v1243_v15, %v1242_v13  ;;  %v1246_v30 = vld [vmem:[%s2484_s15 + $0x30] sm:$0xff] }
 0x3ef   : > { %v1058_v33 = vpack.c.bf16 %v1057_v31, %v1057_v31  ;;  %v1247_v31 = vld [vmem:[%s2484_s15 + $0x38] sm:$0xff] }
 0x3f1   : > { %1642 = vmatmul.mubr.msk.bf16.vlgmr.msra.gmra.mrb[8].mxu0 %vm930_vm4, %v1058_v33  ;;  %v1556_v33 = vld [vmem:[%s2483_s14] ss:$0 sm:$0xff] }
 0x3f2   : > { %1654 = vmatpush3.bf16.msra.mxu0 %v991_v32  ;;  %1657 = vmatprep.mubr.msk.bf16.mxu0 %vm1959_vm0, %v1958_v0  ;;  %v1306_v32 = vpack.c.bf16 %v1247_v31, %v1246_v30 }
 0x3f3   : > { %1655 = vmatprep.subr.bf16.mxu0 %v1958_v0 }
 0x3f6   : > { %1656 = vmatpush3.bf16.msra.mxu0 %v992_v36 }
 0x3f7   : > { %1669 = vmatprep.subr.bf16.mxu0 %v1958_v0 }
 0x451   : > { %v984_v40 = vpop.f32.mrb[4].mxu0 }
 0x452   : > { %v990_v41 = vpack.c.bf16 %v984_v40, %v984_v40  ;;  %v1631_v42 = vpop.f32.mrb[5].mxu0  ;;  %v1558_v40 = vld [vmem:[%s2485_s16] ss:$0 sm:$0xff] }
 0x453   : > { %v987_v43 = vpop.f32.mrb[6].mxu0 }
 0x454   : > { %v1632_v44 = vpop.f32.mrb[7].mxu0  ;;  %1658 = vmatmul.mubr.msk.bf16.vlgmr.msra.gmra.mrb[12].mxu0 %vm712_vm1, %v990_v41 }
 0x455   : > { %1677 = vmatprep.mubr.msk.bf16.mxu0 %vm1959_vm0, %v1958_v0  ;;  %1670 = vmatpush3.bf16.msra.mxu0 %v1303_v14 }
 0x456   : > { %1671 = vmatprep.subr.bf16.mxu0 %v1958_v0 }
 0x459   : > { %1672 = vmatpush3.bf16.msra.mxu0 %v1304_v16 }
 0x45a   : > { %1673 = vmatprep.subr.bf16.mxu0 %v1958_v0 }
 0x45d   : > { %1674 = vmatpush3.bf16.msra.mxu0 %v1305_v29 }
 0x45e   : > { %1675 = vmatprep.subr.bf16.mxu0 %v1958_v0 }
 0x461   : > { %1676 = vmatpush3.bf16.msra.mxu0 %v1306_v32 }
 0x4c4   : > { %v1102_v45 = vpop.f32.mrb[8].mxu0 }
 0x4c5   : > { %v1108_v46 = vpack.c.bf16 %v1102_v45, %v1102_v45  ;;  %v1643_v47 = vpop.f32.mrb[9].mxu0 }
 0x4c6   : > { %v1105_v48 = vpop.f32.mrb[10].mxu0 }
 0x4c7   : > { %v1644_v49 = vpop.f32.mrb[11].mxu0  ;;  %1650 = vmatmul.mubr.msk.bf16.vlgmr.msra.gmra.mrb[16].mxu1 %vm712_vm1, %v1108_v46 }
 0x4c8   : > { %1665 = vmatprep.mubr.msk.bf16.mxu1 %vm1959_vm0, %v1958_v0  ;;  %1662 = vmatpush3.bf16.msra.mxu1 %v1250_v8 }
 0x4c9   : > { %1663 = vmatprep.subr.bf16.mxu1 %v1958_v0 }
 0x527   : > { %v1191_v50 = vpop.f32.mrb[12].mxu0 }
 0x528   : > { %v1659_v51 = vpop.f32.mrb[13].mxu0 }
 0x529   : > { %v1194_v52 = vpop.f32.mrb[14].mxu0 }
 0x52a   : > { %v1660_v53 = vpop.f32.mrb[15].mxu0 }
 0x59a   : > { %v1148_v54 = vpop.f32.mrb[16].mxu1 }
 0x59b   : > { %v1192_v56 = vadd.f32 %v1191_v50, %v1148_v54  ;;  %v1651_v57 = vpop.f32.mrb[17].mxu1 }
 0x59c   : > { %v1151_v58 = vpop.f32.mrb[18].mxu1  ;;  %v1560_v57 = vld [vmem:[%s2530_s25] ss:$0 sm:$0xff]  ;;  %s1873_s25 = scalar_lea.vmem %s1872_s29, 256 }
 0x59d   : > { %v1204_v59 = vadd.f32 %v1553_v55, %v1192_v56  ;;  %v1652_v60 = vpop.f32.mrb[19].mxu1  ;;  %p1875_p3 = scmp.lt.s32.totalorder %s1873_s25, %s1867_s20 }
 0x59f   : > { %v1205_v61 = vadd.f32 %v1204_v59, %v2238_v7  ;;  %v1238_v7 = vld [vmem:[%s2482_s13 + $0x10] sm:$0xff]  ;;  %v1561_v59 = vld [vmem:[%s2531_s26] ss:$0 sm:$0xff]  ;;  %p1876_p5 = por %p1875_p3, %p1874_p11 }
 0x5a0   : > { %v1251_v10 = vpack.c.bf16 %v1239_v9, %v1238_v7 }
 0x5a1   : > { %v1206_v62 = vsel %vm712_vm1, %v1205_v61, 0.0  ;;  %p1877_p6 = pnand %p1876_p5, %p1870_p10 }
 0x5a2   : > { %1207 = vadd.xlane.f32.xlu1 %v1206_v62  ;;  %1664 = vmatpush3.bf16.msra.mxu1 %v1251_v10 }
 0x62f   : > { %v1208_v63 = vpop.xlane.xlu1 %1207 }
 0x630   : > { %v1210_v1 = vmul.f32 0.03125, %v1208_v63 }
 0x632   : > { %v1211_v2 = vsub.f32 %v1205_v61, %v1210_v1 }
 0x634   : > { %v1212_v3 = vmul.f32 %v1211_v2, %v1211_v2 }
 0x636   : > { %v1213_v4 = vsel %vm712_vm1, %v1212_v3, 0.0 }
 0x637   : > { %1214 = vadd.xlane.f32.xlu0 %v1213_v4 }
 0x6c4   : > { %v1215_v17 = vpop.xlane.xlu0 %1214 }
 0x6c5   : > { %v1216_v18 = vmul.f32 0.03125, %v1215_v17 }
 0x6c7   : > { %v1217_v19 = vadd.f32 1e-05, %v1216_v18 }
 0x6c9   : > { %1779 = vrsqrt.f32 %v1217_v19 }
 0x6d3   : > { %v1780_v20 = vpop.eup %1779 }
 0x6d4   : > { %v1219_v22 = vmul.f32 %v1780_v20, %v1211_v2 }
 0x6d6   : > { %v1227_v24 = vmul.f32 %v1554_v21, %v1219_v22 }
 0x6d8   : > { %v1235_v25 = vadd.f32 %v1555_v23, %v1227_v24 }
 0x6da   : > { %v1249_v26 = vpack.c.bf16 %v1235_v25, %v1235_v25 }
 0x6dc   : > { %1666 = vmatmul.mubr.msk.bf16.vlgmr.msra.gmra.mrb[20].mxu1 %vm712_vm1, %v1249_v26 }
 0x7af   : > { %v1295_v34 = vpop.f32.mrb[20].mxu1 }
 0x7b0   : > { %v1296_v35 = vadd.f32 %v1556_v33, %v1295_v34  ;;  %v1667_v36 = vpop.f32.mrb[21].mxu1 }
 0x7b1   : > { %v1298_v37 = vpop.f32.mrb[22].mxu1 }
 0x7b2   : > { %v1301_v38 = vmax.f32 %v1296_v35, 0.0  ;;  %v1668_v0 = vpop.f32.mrb[23].mxu1 }
 0x7b4   : > { %v1302_v39 = vpack.c.bf16 %v1301_v38, %v1301_v38 }
 0x7b6   : > { %1678 = vmatmul.mubr.msk.bf16.vlgmr.msra.gmra.mrb[16].mxu0 %vm1314_vm6, %v1302_v39 }
 0x889   : > { %v1352_v41 = vpop.f32.mrb[16].mxu0 }
 0x88a   : > { %v1353_v42 = vadd.f32 %v1558_v40, %v1352_v41  ;;  %v1679_v43 = vpop.f32.mrb[17].mxu0 }
 0x88b   : > { %v1355_v44 = vpop.f32.mrb[18].mxu0 }
 0x88c   : > { %v1680_v45 = vpop.f32.mrb[19].mxu0  ;;  %v1358_v46 = vadd.f32 %v1353_v42, %v1235_v25 }
 0x88e   : > { %v1359_v47 = vsel %vm712_vm1, %v1358_v46, 0.0 }
 0x88f   : > { %1360 = vadd.xlane.f32.xlu0 %v1359_v47 }
 0x91c   : > { %v1361_v48 = vpop.xlane.xlu0 %1360 }
 0x91d   : > { %v1362_v49 = vmul.f32 0.03125, %v1361_v48 }
 0x91f   : > { %v1363_v50 = vsub.f32 %v1358_v46, %v1362_v49 }
 0x921   : > { %v1364_v51 = vmul.f32 %v1363_v50, %v1363_v50 }
 0x923   : > { %v1365_v52 = vsel %vm712_vm1, %v1364_v51, 0.0 }
 0x924   : > { %1366 = vadd.xlane.f32.xlu0 %v1365_v52 }
 0x9b1   : > { %v1367_v53 = vpop.xlane.xlu0 %1366 }
 0x9b2   : > { %v1368_v54 = vmul.f32 0.03125, %v1367_v53 }
 0x9b4   : > { %v1369_v55 = vadd.f32 1e-05, %v1368_v54 }
 0x9b6   : > { %1781 = vrsqrt.f32 %v1369_v55 }
 0x9c0   : > { %v1782_v56 = vpop.eup %1781 }
 0x9c1   : > { %v1371_v58 = vmul.f32 %v1782_v56, %v1363_v50 }
 0x9c3   : > { %v1379_v60 = vmul.f32 %v1560_v57, %v1371_v58 }
 0x9c5   : > { %v1387_v61 = vadd.f32 %v1561_v59, %v1379_v60 }
 0x9c7   : > { %1388 = vst.msk [vmem:[%s677_s1] sm:$0xff] %vm712_vm1, %v1387_v61 }
 0x9c8   : > { %1880 = shalt.err (!%p1877_p6)
}
 0x9c9   : > { %s1881_s24 = scalar_lea.hbm %s2421_s0, 128  ;;  %s1885_s26 = scalar_lea.hbm %s2532_s2, 256 }
 0x9ca   : > { %p1882_p7 = scmp.ne.s32.totalorder %s2421_s0, %s1881_s24  ;;  %p1886_p0 = scmp.lt.u32.totalorder %s2421_s0, %s2532_s2 }
 0x9cb   : > { %p1887_p2 = scmp.lt.u32.totalorder %s1885_s26, %s1881_s24  ;;  %p1889_p13 = scmp.lt.u32.totalorder %s1881_s24, %s2421_s0 }
 0x9cc   : > { %p1883_p9 = pnand %p1882_p7, %p2533_p4 }
 0x9cd   : > { %p1888_p1 = por %p1887_p2, %p1886_p0 }
 0x9ce   : > { %p1884_p12 = pneg %p1883_p9 }
 0x9cf   : > { %p1890_p8 = por %p1889_p13, %p1888_p1 }
 0x9d1   : > { %p1891_p10 = pnand %p1890_p8, %p1884_p12 }
 0x9d3   : > { %1894 = shalt.err (!%p1891_p10)
}
 0x9d4   : > { %1693 = dma.vmem_to_hbm [thread:$0]  (%p2533_p4), %s2423_s6, 128, %s2421_s0, %s1390_s19  }
 0x9d5 PF: > { %s2534_s18 = sld [smem:[#allocation15_spill]]  ;;  %s2535_s27 = sld [smem:[#allocation12_spill]] }
 0x9d6   : > { %s2536_s20 = sld [smem:[#allocation17_spill]] }
 0x9db   : > { %p1715_p11 = scmp.ge.s32.totalorder %s2534_s18, 2  ;;  %s1416_s21 = sand.u32 1, %s2535_s27  }
 0x9dc   : > { %p2537_p3 = scmp.ne.s32.totalorder %s2536_s20, 0  ;;  %s1417_s29 = scalar_lea.sflag [#allocation4], %s1416_s21 }
 0x9de   : > { %p1706_p5 = pnand %p1715_p11, %p2537_p3 }
 0x9e0   : > { %1928 = dma.done.wait (!%p1706_p5), %s1417_s29, 128  }
 0x9e1   : > { %1930 = vsyncadd (!%p1706_p5), %s1417_s29, 4294967168  ;;  %s34_s22 = sadd.s32 1, %s2534_s18   ;;  %s2538_s25 = sld [smem:[#allocation13_spill]] }
 0x9e2   : > { %p31_p6 = scmp.ge.s32.totalorder %s34_s22, 4   ;;  %s2539_s20 = sld [smem:[#allocation18_spill]] }
 0x9e3   : > { %s2540_s21 = sld [smem:[#allocation14_spill]]  ;;  %s2541_s1 = sld [smem:[#allocation16_spill]] }
 0x9e4   : > { %s2542_s0 = smov %s1937_s30  ;;  %33 = sbr.rel (!%p31_p6) target bundleno = 15 (0xf), region = 150 }
 0x9e7   : > { %s2543_s30 = smov %s2538_s25 }
 0x9eb   :  { %1422 = vsyncpa [#allocation3], 1 }
 0x9ec   :  { %1424 = vsyncpa [#allocation3 + $0x1], 1 }
 0x9ed   :  { %1425 = vsyncpa [#allocation6], 1 }
 0x9ee   :  { %1426 = vsyncpa [#allocation4], 1 }
 0x9ef   :  { %1428 = vsyncpa [#allocation4 + $0x1], 1 }

</bundles_post_ra>
